<compile_context>
chip_gen: v5e
topology: v5e:2x2
jax: 0.10.0
libtpu: 0.0.40
codegen_flags: <defaults>
</compile_context>

<pallas_src>
import jax
import jax.numpy as jnp
from jax import lax
from jax.experimental import pallas as pl
from jax.experimental.pallas import tpu as pltpu

NUM_EXPERTS = 5
TOP_K = 2


def gating_kernel(x_ref, wr_ref, br_ref, wn_ref, bn_ref, noise_ref,
                  router_ref, idx_ref):
    x = x_ref[...]                                            # (tm, C) f32

    # Two narrow MXU passes (num_experts output lanes each), f32 accumulate.
    logits = jnp.dot(x, wr_ref[...],
                     preferred_element_type=jnp.float32) + br_ref[...]
    noise_logits = jnp.dot(x, wn_ref[...],
                           preferred_element_type=jnp.float32) + bn_ref[...]

    # softplus (matches F.softplus, beta=1, threshold=20), f32 on VPU/EUP
    sp = jnp.where(noise_logits > 20.0, noise_logits,
                   jnp.log1p(jnp.exp(jnp.minimum(noise_logits, 20.0))))

    noisy = logits + noise_ref[...] * sp                      # (tm, E) f32

    tm, e = noisy.shape
    lane = lax.broadcasted_iota(jnp.int32, (tm, e), 1)
    neg_inf = jnp.float32(-jnp.inf)

    # top-1 / top-2 with first-occurrence tie-breaking (matches torch.topk)
    m1 = jnp.max(noisy, axis=-1, keepdims=True)
    i1 = jnp.min(jnp.where(noisy == m1, lane, e), axis=-1, keepdims=True)
    masked = jnp.where(lane == i1, neg_inf, noisy)
    m2 = jnp.max(masked, axis=-1, keepdims=True)
    i2 = jnp.min(jnp.where(masked == m2, lane, e), axis=-1, keepdims=True)

    # Sparse softmax over the two surviving lanes:
    #   softmax([-inf ... m1 ... m2 ... -inf]) -> {1, exp(m2-m1)} / (1 + exp(m2-m1))
    e2 = jnp.exp(m2 - m1)                                     # (tm, 1)
    inv = 1.0 / (1.0 + e2)                                    # exact divide
    router_ref[...] = jnp.where(lane == i1, inv,
                                jnp.where(lane == i2, e2 * inv, 0.0))

    # indices sorted by descending value, single narrow store
    col = lax.broadcasted_iota(jnp.int32, (tm, TOP_K), 1)
    idx_ref[...] = jnp.where(col == 0, i1, i2).astype(jnp.int32)


def gating_forward(x_flat, w_route, b_route, w_noise, b_noise, noise_flat,
                   *, tm=1024):
    """Noisy top-k gating forward.

    x_flat:     (N, C) f32 flattened mh_output
    w_*:        (C, E) f32 (nn.Linear weight transposed, done once at setup)
    b_*:        (1, E) f32
    noise_flat: (N, E) f32 standard-normal noise (randn_like(logits))
    returns:    router (N, E) f32, indices (N, TOP_K) i32
    """
    N, C = x_flat.shape
    E = w_route.shape[1]
    assert E == NUM_EXPERTS

    def rup(a, b):
        return ((a + b - 1) // b) * b

    # --- row-tile selection -------------------------------------------------
    # big tiles, multiple of 8 sublanes, bounded by:
    #   (a) double-buffered f32 x tiles <= ~24 MiB (fits v7x scoped VMEM)
    #   (b) for large N, keep >= ~8 grid steps so the v7x megacore pipeline
    #       has prefetch/writeback overlap (but never drop below 256 rows)
    x_tile_budget = 24 * 1024 * 1024
    tm_vmem_cap = max(64, (x_tile_budget // (2 * 4 * C)) // 8 * 8)
    tm_eff = min(tm, tm_vmem_cap, rup(N, 8))
    if N >= 512:
        tm_eff = min(tm_eff, max(256, rup(pl.cdiv(N, 8), 8)))

    # Ragged tail: the last block's out-of-bounds rows are computed on garbage
    # and masked on writeback by Pallas — no wrapper-side jnp.pad pass needed.
    grid = (pl.cdiv(N, tm_eff),)

    router, idx = pl.pallas_call(
        gating_kernel,
        out_shape=(jax.ShapeDtypeStruct((N, E), jnp.float32),
                   jax.ShapeDtypeStruct((N, TOP_K), jnp.int32)),
        grid_spec=pltpu.PrefetchScalarGridSpec(
            num_scalar_prefetch=0,
            grid=grid,
            in_specs=[
                pl.BlockSpec((tm_eff, C), lambda i: (i, 0)),       # x tile (f32)
                pl.BlockSpec((C, E), lambda i: (0, 0)),            # W_route (resident)
                pl.BlockSpec((1, E), lambda i: (0, 0)),            # b_route (resident)
                pl.BlockSpec((C, E), lambda i: (0, 0)),            # W_noise (resident)
                pl.BlockSpec((1, E), lambda i: (0, 0)),            # b_noise (resident)
                pl.BlockSpec((tm_eff, E), lambda i: (i, 0)),       # N(0,1) noise tile
            ],
            out_specs=[
                pl.BlockSpec((tm_eff, E), lambda i: (i, 0)),       # router probs (narrow)
                pl.BlockSpec((tm_eff, TOP_K), lambda i: (i, 0)),   # top-k indices
            ],
        ),
        compiler_params=pltpu.CompilerParams(
            dimension_semantics=("parallel",),
            vmem_limit_bytes=32 * 1024 * 1024,
        ),
    )(x_flat, w_route, b_route, w_noise, b_noise, noise_flat)

    return router, idx


if __name__ == "__main__":
    B, T, C = 2, 8, 32          # batch, seq, n_embed
    E, K = NUM_EXPERTS, TOP_K

    key = jax.random.PRNGKey(0)
    k_x, k_w1, k_b1, k_w2, k_b2, k_n = jax.random.split(key, 6)

    # Parameters in kernel layout (n_embed, num_experts), built once at setup.
    bound = 1.0 / (C ** 0.5)
    w1 = jax.random.uniform(k_w1, (C, E), jnp.float32, -bound, bound)
    b1 = jax.random.uniform(k_b1, (1, E), jnp.float32, -bound, bound)
    w2 = jax.random.uniform(k_w2, (C, E), jnp.float32, -bound, bound)
    b2 = jax.random.uniform(k_b2, (1, E), jnp.float32, -bound, bound)

    x = jax.random.normal(k_x, (B, T, C), jnp.float32)
    noise = jax.random.normal(k_n, (B, T, E), jnp.float32)   # randn_like(logits)

    x_flat = x.reshape(B * T, C)
    noise_flat = noise.reshape(B * T, E)

    router_flat, idx_flat = gating_forward(x_flat, w1, b1, w2, b2, noise_flat)
    router_output = router_flat.reshape(B, T, E)
    indices = idx_flat.reshape(B, T, K)

    jax.block_until_ready((router_output, indices))

    # sanity: shapes, rows sum to 1, exactly top_k nonzeros, indices consistent
    assert router_output.shape == (B, T, E)
    assert indices.shape == (B, T, K)
    assert bool(jnp.allclose(router_output.sum(-1), 1.0, atol=1e-5))
    assert bool(jnp.all((router_output > 0).sum(-1) == K))
    assert bool(jnp.all((indices >= 0) & (indices < E)))
    assert bool(jnp.all(indices[..., 0] != indices[..., 1]))
    assert bool(jnp.all(jnp.take_along_axis(router_output, indices, -1) > 0))

    print("KERNEL_OK")
</pallas_src>

<mosaic_0001>
module attributes {stable_mosaic.version = 11 : i64} {
  func.func @gating_kernel(%arg0: i32, %arg1: memref<16x32xf32, #tpu.memory_space<vmem>>, %arg2: memref<32x5xf32, #tpu.memory_space<vmem>>, %arg3: memref<1x5xf32, #tpu.memory_space<vmem>>, %arg4: memref<32x5xf32, #tpu.memory_space<vmem>>, %arg5: memref<1x5xf32, #tpu.memory_space<vmem>>, %arg6: memref<16x5xf32, #tpu.memory_space<vmem>>, %arg7: memref<16x5xf32, #tpu.memory_space<vmem>>, %arg8: memref<16x2xi32, #tpu.memory_space<vmem>>) attributes {dimension_semantics = [#tpu.dimension_semantics<parallel>], iteration_bounds = array<i64: 1>, scalar_prefetch = 0 : i64, scratch_operands = 0 : i64, tpu.core_type = #tpu.core_type<tc>, window_params = [{transform_indices = @transform_0, window_bounds = array<i64: 16, 32>}, {pipeline_mode = #tpu.pipeline_mode<synchronous>, transform_indices = @transform_1, window_bounds = array<i64: 32, 5>}, {pipeline_mode = #tpu.pipeline_mode<synchronous>, transform_indices = @transform_2, window_bounds = array<i64: 1, 5>}, {pipeline_mode = #tpu.pipeline_mode<synchronous>, transform_indices = @transform_3, window_bounds = array<i64: 32, 5>}, {pipeline_mode = #tpu.pipeline_mode<synchronous>, transform_indices = @transform_4, window_bounds = array<i64: 1, 5>}, {transform_indices = @transform_5, window_bounds = array<i64: 16, 5>}, {transform_indices = @transform_6, window_bounds = array<i64: 16, 5>}, {transform_indices = @transform_7, window_bounds = array<i64: 16, 2>}]} {
    %c0 = arith.constant 0 : index
    %c0_0 = arith.constant 0 : index
    %0 = vector.load %arg1[%c0, %c0_0] : memref<16x32xf32, #tpu.memory_space<vmem>>, vector<16x32xf32>
    %c0_1 = arith.constant 0 : index
    %c0_2 = arith.constant 0 : index
    %1 = vector.load %arg2[%c0_1, %c0_2] : memref<32x5xf32, #tpu.memory_space<vmem>>, vector<32x5xf32>
    %cst = arith.constant dense<0.000000e+00> : vector<16x5xf32>
    %2 = tpu.matmul %0, %1, %cst {dimension_numbers = #tpu.dot_dimension_numbers<[1], [0], [0], [1], [0, 0, 1, 1], [], []>} : vector<16x32xf32>, vector<32x5xf32>, vector<16x5xf32> -> vector<16x5xf32>
    %c0_3 = arith.constant 0 : index
    %c0_4 = arith.constant 0 : index
    %3 = vector.load %arg3[%c0_3, %c0_4] : memref<1x5xf32, #tpu.memory_space<vmem>>, vector<1x5xf32>
    %4 = vector.broadcast %3 : vector<1x5xf32> to vector<16x5xf32>
    %5 = arith.addf %2, %4 : vector<16x5xf32>
    %c0_5 = arith.constant 0 : index
    %c0_6 = arith.constant 0 : index
    %6 = vector.load %arg4[%c0_5, %c0_6] : memref<32x5xf32, #tpu.memory_space<vmem>>, vector<32x5xf32>
    %cst_7 = arith.constant dense<0.000000e+00> : vector<16x5xf32>
    %7 = tpu.matmul %0, %6, %cst_7 {dimension_numbers = #tpu.dot_dimension_numbers<[1], [0], [0], [1], [0, 0, 1, 1], [], []>} : vector<16x32xf32>, vector<32x5xf32>, vector<16x5xf32> -> vector<16x5xf32>
    %c0_8 = arith.constant 0 : index
    %c0_9 = arith.constant 0 : index
    %8 = vector.load %arg5[%c0_8, %c0_9] : memref<1x5xf32, #tpu.memory_space<vmem>>, vector<1x5xf32>
    %9 = vector.broadcast %8 : vector<1x5xf32> to vector<16x5xf32>
    %10 = arith.addf %7, %9 : vector<16x5xf32>
    %cst_10 = arith.constant 2.000000e+01 : f32
    %11 = vector.broadcast %cst_10 : f32 to vector<16x5xf32>
    %12 = arith.cmpf ogt, %10, %11 : vector<16x5xf32>
    %cst_11 = arith.constant 2.000000e+01 : f32
    %13 = vector.broadcast %cst_11 : f32 to vector<16x5xf32>
    %14 = arith.minimumf %10, %13 : vector<16x5xf32>
    %15 = math.exp %14 : vector<16x5xf32>
    %16 = math.log1p %15 : vector<16x5xf32>
    %17 = arith.select %12, %10, %16 : vector<16x5xi1>, vector<16x5xf32>
    %c0_12 = arith.constant 0 : index
    %c0_13 = arith.constant 0 : index
    %18 = vector.load %arg6[%c0_12, %c0_13] : memref<16x5xf32, #tpu.memory_space<vmem>>, vector<16x5xf32>
    %19 = arith.mulf %18, %17 : vector<16x5xf32>
    %20 = arith.addf %5, %19 : vector<16x5xf32>
    %21 = tpu.iota {dimensions = array<i32: 1>} : vector<16x5xi32>
    %cst_14 = arith.constant dense<0xFF800000> : vector<16xf32>
    %22 = vector.multi_reduction <maximumf>, %20, %cst_14 [1] : vector<16x5xf32> to vector<16xf32>
    %23 = vector.shape_cast %22 : vector<16xf32> to vector<16x1xf32>
    %24 = vector.broadcast %23 : vector<16x1xf32> to vector<16x5xf32>
    %25 = arith.cmpf oeq, %20, %24 : vector<16x5xf32>
    %c5_i32 = arith.constant 5 : i32
    %26 = vector.broadcast %c5_i32 : i32 to vector<16x5xi32>
    %27 = arith.select %25, %21, %26 : vector<16x5xi1>, vector<16x5xi32>
    %cst_15 = arith.constant dense<2147483647> : vector<16xi32>
    %28 = vector.multi_reduction <minsi>, %27, %cst_15 [1] : vector<16x5xi32> to vector<16xi32>
    %29 = vector.shape_cast %28 : vector<16xi32> to vector<16x1xi32>
    %30 = vector.broadcast %29 : vector<16x1xi32> to vector<16x5xi32>
    %31 = arith.cmpi eq, %21, %30 : vector<16x5xi32>
    %cst_16 = arith.constant 0xFF800000 : f32
    %32 = vector.broadcast %cst_16 : f32 to vector<16x5xf32>
    %33 = arith.select %31, %32, %20 : vector<16x5xi1>, vector<16x5xf32>
    %cst_17 = arith.constant dense<0xFF800000> : vector<16xf32>
    %34 = vector.multi_reduction <maximumf>, %33, %cst_17 [1] : vector<16x5xf32> to vector<16xf32>
    %35 = vector.shape_cast %34 : vector<16xf32> to vector<16x1xf32>
    %36 = vector.broadcast %35 : vector<16x1xf32> to vector<16x5xf32>
    %37 = arith.cmpf oeq, %33, %36 : vector<16x5xf32>
    %c5_i32_18 = arith.constant 5 : i32
    %38 = vector.broadcast %c5_i32_18 : i32 to vector<16x5xi32>
    %39 = arith.select %37, %21, %38 : vector<16x5xi1>, vector<16x5xi32>
    %cst_19 = arith.constant dense<2147483647> : vector<16xi32>
    %40 = vector.multi_reduction <minsi>, %39, %cst_19 [1] : vector<16x5xi32> to vector<16xi32>
    %41 = vector.shape_cast %40 : vector<16xi32> to vector<16x1xi32>
    %42 = arith.subf %35, %23 : vector<16x1xf32>
    %43 = math.exp %42 : vector<16x1xf32>
    %cst_20 = arith.constant 1.000000e+00 : f32
    %44 = vector.broadcast %cst_20 : f32 to vector<16x1xf32>
    %45 = arith.addf %44, %43 : vector<16x1xf32>
    %cst_21 = arith.constant 1.000000e+00 : f32
    %46 = vector.broadcast %cst_21 : f32 to vector<16x1xf32>
    %47 = arith.divf %46, %45 : vector<16x1xf32>
    %48 = vector.broadcast %29 : vector<16x1xi32> to vector<16x5xi32>
    %49 = arith.cmpi eq, %21, %48 : vector<16x5xi32>
    %50 = vector.broadcast %41 : vector<16x1xi32> to vector<16x5xi32>
    %51 = arith.cmpi eq, %21, %50 : vector<16x5xi32>
    %52 = arith.mulf %43, %47 : vector<16x1xf32>
    %cst_22 = arith.constant 0.000000e+00 : f32
    %53 = vector.shape_cast %52 : vector<16x1xf32> to vector<16x1xf32>
    %54 = vector.broadcast %53 : vector<16x1xf32> to vector<16x5xf32>
    %55 = vector.broadcast %cst_22 : f32 to vector<16x5xf32>
    %56 = arith.select %51, %54, %55 : vector<16x5xi1>, vector<16x5xf32>
    %57 = vector.shape_cast %47 : vector<16x1xf32> to vector<16x1xf32>
    %58 = vector.broadcast %57 : vector<16x1xf32> to vector<16x5xf32>
    %59 = arith.select %49, %58, %56 : vector<16x5xi1>, vector<16x5xf32>
    %c0_23 = arith.constant 0 : index
    %c0_24 = arith.constant 0 : index
    %60 = vector.load %arg7[%c0_23, %c0_24] : memref<16x5xf32, #tpu.memory_space<vmem>>, vector<16x5xf32>
    tpu.vector_store %arg7[%c0_23, %c0_24], %59 {strides = array<i32>} : memref<16x5xf32, #tpu.memory_space<vmem>>, vector<16x5xf32>,
    %61 = tpu.iota {dimensions = array<i32: 1>} : vector<16x2xi32>
    %c0_i32 = arith.constant 0 : i32
    %62 = vector.broadcast %c0_i32 : i32 to vector<16x2xi32>
    %63 = arith.cmpi eq, %61, %62 : vector<16x2xi32>
    %64 = vector.shape_cast %29 : vector<16x1xi32> to vector<16x1xi32>
    %65 = vector.broadcast %64 : vector<16x1xi32> to vector<16x2xi32>
    %66 = vector.shape_cast %41 : vector<16x1xi32> to vector<16x1xi32>
    %67 = vector.broadcast %66 : vector<16x1xi32> to vector<16x2xi32>
    %68 = arith.select %63, %65, %67 : vector<16x2xi1>, vector<16x2xi32>
    %c0_25 = arith.constant 0 : index
    %c0_26 = arith.constant 0 : index
    %69 = vector.load %arg8[%c0_25, %c0_26] : memref<16x2xi32, #tpu.memory_space<vmem>>, vector<16x2xi32>
    tpu.vector_store %arg8[%c0_25, %c0_26], %68 {strides = array<i32>} : memref<16x2xi32, #tpu.memory_space<vmem>>, vector<16x2xi32>,
    return
  }
  func.func @transform_0(%arg0: i32) -> (i32, i32) {
    %c0_i32 = arith.constant 0 : i32
    %c0_i32_0 = arith.constant 0 : i32
    return %arg0, %c0_i32 : i32, i32
  }
  func.func @transform_1(%arg0: i32) -> (i32, i32) {
    %c0_i32 = arith.constant 0 : i32
    %c0_i32_0 = arith.constant 0 : i32
    %c0_i32_1 = arith.constant 0 : i32
    return %c0_i32, %c0_i32_0 : i32, i32
  }
  func.func @transform_2(%arg0: i32) -> (i32, i32) {
    %c0_i32 = arith.constant 0 : i32
    %c0_i32_0 = arith.constant 0 : i32
    %c0_i32_1 = arith.constant 0 : i32
    return %c0_i32, %c0_i32_0 : i32, i32
  }
  func.func @transform_3(%arg0: i32) -> (i32, i32) {
    %c0_i32 = arith.constant 0 : i32
    %c0_i32_0 = arith.constant 0 : i32
    %c0_i32_1 = arith.constant 0 : i32
    return %c0_i32, %c0_i32_0 : i32, i32
  }
  func.func @transform_4(%arg0: i32) -> (i32, i32) {
    %c0_i32 = arith.constant 0 : i32
    %c0_i32_0 = arith.constant 0 : i32
    %c0_i32_1 = arith.constant 0 : i32
    return %c0_i32, %c0_i32_0 : i32, i32
  }
  func.func @transform_5(%arg0: i32) -> (i32, i32) {
    %c0_i32 = arith.constant 0 : i32
    %c0_i32_0 = arith.constant 0 : i32
    return %arg0, %c0_i32 : i32, i32
  }
  func.func @transform_6(%arg0: i32) -> (i32, i32) {
    %c0_i32 = arith.constant 0 : i32
    %c0_i32_0 = arith.constant 0 : i32
    return %arg0, %c0_i32 : i32, i32
  }
  func.func @transform_7(%arg0: i32) -> (i32, i32) {
    %c0_i32 = arith.constant 0 : i32
    %c0_i32_0 = arith.constant 0 : i32
    return %arg0, %c0_i32 : i32, i32
  }
}

</mosaic_0001>

<bundles_post_ra>
// kernel: tpu_custom_call.1
= control target key start
LH: loop header
LB: loop body
LE: loop exit
PB: predicated region body
PF: predicated region fallthrough
CT: control target
= control target key end

     0   :  { %vm35_vm0 = vcmask 261120   ;;  %vm132_vm3 = vcmask 39936   ;;  %v130_v52 = vlaneseq  ;;  %s458_s3 = inlined_call_operand.vmem [shape: f32[32,5], index: 3, kind: input, shape index: {}]   ;;  %s459_s1 = inlined_call_operand.vmem [shape: f32[32,5], index: 1, kind: input, shape index: {}]   ;;  %s460_s0 = inlined_call_operand.vmem [shape: f32[16,32], index: 0, kind: input, shape index: {}]   ;;  %s461_s4 = inlined_call_operand.vmem [shape: f32[1,5], index: 4, kind: input, shape index: {}]   ;;  %s462_s2 = inlined_call_operand.vmem [shape: f32[1,5], index: 2, kind: input, shape index: {}]   ;;  %s463_s5 = inlined_call_operand.vmem [shape: f32[16,5], index: 5, kind: input, shape index: {}]   ;;  %s464_s7 = inlined_call_operand.vmem [shape: s32[16,2], index: 7, kind: output, shape index: {1}]   ;;  %s465_s6 = inlined_call_operand.vmem [shape: f32[16,5], index: 6, kind: output, shape index: {0}]  }
   0x1   :  { %v68_v0 = vld [vmem:[%s458_s3 + $0x18] sm:$0xff]  ;;  %v67_v1 = vld [vmem:[%s458_s3 + $0x10] sm:$0xff]  ;;  %v66_v2 = vld [vmem:[%s458_s3 + $0x8] sm:$0xff] }
   0x2   :  { %85 = vmatpush.msra.mxu1 %v68_v0  ;;  %287 = vmatpush.msra.mxu3 %v68_v0  ;;  %v30_v3 = vld [vmem:[%s459_s1 + $0x18] sm:$0xff]  ;;  %v29_v4 = vld [vmem:[%s459_s1 + $0x10] sm:$0xff]  ;;  %v65_v5 = vld [vmem:[%s458_s3] sm:$0xff]  ;;  %v393_v53 = vand.u32 127, %v130_v52 }
   0x3   :  { %54 = vmatpush.msra.mxu0 %v30_v3  ;;  %283 = vmatpush.msra.mxu2 %v30_v3  ;;  %v25_v6 = vld [vmem:[%s460_s0] sm:$0xff]  ;;  %v26_v7 = vld [vmem:[%s460_s0 + $0x8] sm:$0xff] }
   0x4   :  { %86 = vmatpush.msra.mxu1 %v67_v1  ;;  %288 = vmatpush.msra.mxu3 %v67_v1  ;;  %v28_v8 = vld [vmem:[%s459_s1 + $0x8] sm:$0xff]  ;;  %v27_v9 = vld [vmem:[%s459_s1] sm:$0xff] }
   0x5   :  { %55 = vmatpush.msra.mxu0 %v29_v4  ;;  %284 = vmatpush.msra.mxu2 %v29_v4  ;;  %v291_v10 = vld [vmem:[%s461_s4] ss:$0 sm:$0xff]  ;;  %v125_v44 = vld [vmem:[%s463_s5 + $0x8] sm:$0xff] }
   0x6   :  { %87 = vmatpush.msra.mxu1 %v66_v2  ;;  %289 = vmatpush.msra.mxu3 %v66_v2  ;;  %v292_v27 = vld [vmem:[%s462_s2] ss:$0 sm:$0xff] }
   0x7   :  { %56 = vmatpush.msra.mxu0 %v28_v8  ;;  %285 = vmatpush.msra.mxu2 %v28_v8  ;;  %v124_v32 = vld [vmem:[%s463_s5] sm:$0xff] }
   0x8   :  { %88 = vmatpush.msra.mxu1 %v65_v5  ;;  %290 = vmatpush.msra.mxu3 %v65_v5 }
   0x9   :  { %281 = vmatmul.msk.f32.vlgmr.msra.gmra.mxu1 %vm35_vm0, %v25_v6  ;;  %282 = vmatmul.msk.f32.vlgmr.msra.gmra.mxu3 %vm35_vm0, %v26_v7 }
   0xa   :  { %57 = vmatpush.msra.mxu0 %v27_v9  ;;  %286 = vmatpush.msra.mxu2 %v27_v9 }
   0xb   :  { %279 = vmatmul.msk.f32.vlgmr.msra.gmra.mxu0 %vm35_vm0, %v25_v6  ;;  %280 = vmatmul.msk.f32.vlgmr.msra.gmra.mxu2 %vm35_vm0, %v26_v7 }
  0x86   :  { %v90_v11 = vpop.f32.mrf.mxu1 }
  0x87   :  { %v91_v12 = vadd.f32 %v291_v10, %v90_v11 }
  0x88   :  { %v59_v29 = vpop.f32.mrf.mxu0 }
  0x89   :  { %v98_v13 = vmin.f32 %v91_v12, 20.0  ;;  %vm96_vm2 = vcmp.gt.f32.partialorder %v91_v12, 20.0  ;;  %v60_v35 = vadd.f32 %v292_v27, %v59_v29 }
  0x8b   :  { %v100_v14 = vmul.f32 1.442695, %v98_v13 }
  0x8c   :  { %v93_v15 = vpop.f32.mrf.mxu3 }
  0x8d   :  { %293 = vpow2.f32 %v100_v14  ;;  %v94_v16 = vadd.f32 %v291_v10, %v93_v15 }
  0x8e   :  { %v62_v40 = vpop.f32.mrf.mxu2 }
  0x8f   :  { %v99_v17 = vmin.f32 %v94_v16, 20.0  ;;  %vm97_vm5 = vcmp.gt.f32.partialorder %v94_v16, 20.0  ;;  %v63_v46 = vadd.f32 %v292_v27, %v62_v40 }
  0x91   :  { %v102_v18 = vmul.f32 1.442695, %v99_v17 }
  0x93   :  { %v294_v19 = vpop.eup %293  ;;  %295 = vpow2.f32 %v102_v18 }
  0x94   :  { %v104_v20 = vadd.f32 1.0, %v294_v19  ;;  %v107_v21 = vmul.f32 -0.5, %v294_v19  ;;  %v110_v24 = vand.u32 2147483647, %v294_v19 }
  0x96   :  { %297 = vlog2.f32 %v104_v20  ;;  %v108_v23 = vadd.f32 1.0, %v107_v21  ;;  %vm111_vm1 = vcmp.lt.f32.partialorder %v110_v24, 0.0004427343 }
  0x98   :  { %v109_v31 = vmul.f32 %v294_v19, %v108_v23 }
  0x99   :  { %v296_v22 = vpop.eup %295 }
  0x9a   :  { %v113_v25 = vadd.f32 1.0, %v296_v22  ;;  %v116_v26 = vmul.f32 -0.5, %v296_v22  ;;  %v119_v37 = vand.u32 2147483647, %v296_v22 }
  0x9c   :  { %v298_v28 = vpop.eup %297  ;;  %299 = vlog2.f32 %v113_v25  ;;  %v117_v34 = vadd.f32 1.0, %v116_v26  ;;  %vm120_vm4 = vcmp.lt.f32.partialorder %v119_v37, 0.0004427343 }
  0x9d   :  { %v106_v30 = vmul.f32 0.6931472, %v298_v28 }
  0x9e   :  { %v118_v42 = vmul.f32 %v296_v22, %v117_v34 }
  0x9f   :  { %v112_v33 = vsel %vm111_vm1, %v109_v31, %v106_v30 }
  0xa0   :  { %v122_v36 = vsel %vm96_vm2, %v91_v12, %v112_v33 }
  0xa1   :  { %v126_v38 = vmul.f32 %v124_v32, %v122_v36 }
  0xa2   :  { %v300_v39 = vpop.eup %299 }
  0xa3   :  { %v115_v41 = vmul.f32 0.6931472, %v300_v39  ;;  %v128_v43 = vadd.f32 %v126_v38, %v60_v35 }
  0xa5   :  { %v121_v45 = vsel %vm120_vm4, %v118_v42, %v115_v41  ;;  %v133_v47 = vsel %vm132_vm3, %v128_v43, -inf }
  0xa6   :  { %v123_v48 = vsel %vm97_vm5, %v94_v16, %v121_v45  ;;  %134 = vmax.xlane.f32.xlu0 %v133_v47  ;;  %vm265_vm5 = vcmp.eq.s32.totalorder %v393_v53, 0 }
  0xa7   :  { %v127_v49 = vmul.f32 %v125_v44, %v123_v48 }
  0xa9   :  { %v129_v50 = vadd.f32 %v127_v49, %v63_v46 }
  0xab   :  { %v136_v51 = vsel %vm132_vm3, %v129_v50, -inf }
  0xae   :  { %137 = vmax.xlane.f32.xlu0 %v136_v51 }
 0x119   :  { %v395_v54 = vpop.xlane.xlu0 %134 }
 0x11a   :  { %vm139_vm6 = vcmp.eq.f32.partialorder %v128_v43, %v395_v54 }
 0x11b   :  { %v141_v55 = vsel %vm139_vm6, %v393_v53, 5 }
 0x11c   :  { %v143_v56 = vsel %vm132_vm3, %v141_v55, 2147483647 }
 0x11d   :  { %v145_v57 = vshra.s32 %v143_v56, 16  ;;  %v144_v0 = vand.u32 65535, %v143_v56 }
 0x11f   :  { %v147_v58 = vcvt.s32.f32 %v145_v57  ;;  %v146_v2 = vcvt.s32.f32 %v144_v0 }
 0x121   :  { %148 = vmin.xlane.f32.xlu1 %v147_v58  ;;  %v400_v59 = vpop.xlane.xlu0 %137 }
 0x122   :  { %vm140_vm7 = vcmp.eq.f32.partialorder %v129_v50, %v400_v59 }
 0x123   :  { %v142_v60 = vsel %vm140_vm7, %v393_v53, 5  ;;  %vm268_vm7 = vcmask 15360  }
 0x124   :  { %v158_v61 = vsel %vm132_vm3, %v142_v60, 2147483647 }
 0x125   :  { %v160_v62 = vshra.s32 %v158_v61, 16  ;;  %v159_v4 = vand.u32 65535, %v158_v61 }
 0x127   :  { %v162_v63 = vcvt.s32.f32 %v160_v62  ;;  %v161_v6 = vcvt.s32.f32 %v159_v4 }
 0x129   :  { %163 = vmin.xlane.f32.xlu1 %v162_v63 }
 0x194   :  { %v149_v1 = vpop.xlane.xlu1 %148 }
 0x195   :  { %vm150_vm8 = vcmp.eq.f32.partialorder %v147_v58, %v149_v1  ;;  %v155_v8 = vcvt.f32.s32 %v149_v1 }
 0x196   :  { %v151_v3 = vsel %vm150_vm8, %v146_v2, inf }
 0x197   :  { %152 = vmin.xlane.f32.xlu2 %v151_v3  ;;  %v156_v10 = vshll.u32 %v155_v8, 16 }
 0x19c   :  { %v164_v5 = vpop.xlane.xlu1 %163 }
 0x19d   :  { %vm165_vm9 = vcmp.eq.f32.partialorder %v162_v63, %v164_v5  ;;  %v170_v13 = vcvt.f32.s32 %v164_v5 }
 0x19e   :  { %v166_v7 = vsel %vm165_vm9, %v161_v6, inf }
 0x19f   :  { %167 = vmin.xlane.f32.xlu2 %v166_v7  ;;  %v171_v17 = vshll.u32 %v170_v13, 16 }
 0x20a   :  { %v153_v9 = vpop.xlane.xlu2 %152 }
 0x20b   :  { %v154_v11 = vcvt.f32.s32 %v153_v9 }
 0x20d   :  { %v405_v12 = vadd.s32 %v156_v10, %v154_v11 }
 0x20f   :  { %vm173_vm10 = vcmp.eq.s32.totalorder %v393_v53, %v405_v12 }
 0x210   :  { %v175_v14 = vsel %vm173_vm10, -inf, %v128_v43 }
 0x211   :  { %v177_v15 = vsel %vm132_vm3, %v175_v14, -inf }
 0x212   :  { %178 = vmax.xlane.f32.xlu0 %v177_v15  ;;  %v168_v16 = vpop.xlane.xlu2 %167 }
 0x213   :  { %v169_v18 = vcvt.f32.s32 %v168_v16 }
 0x215   :  { %v413_v19 = vadd.s32 %v171_v17, %v169_v18 }
 0x217   :  { %vm174_vm11 = vcmp.eq.s32.totalorder %v393_v53, %v413_v19 }
 0x218   :  { %v176_v20 = vsel %vm174_vm11, -inf, %v129_v50 }
 0x219   :  { %v180_v21 = vsel %vm132_vm3, %v176_v20, -inf }
 0x21a   :  { %181 = vmax.xlane.f32.xlu1 %v180_v21 }
 0x285   :  { %v179_v22 = vpop.xlane.xlu0 %178 }
 0x286   :  { %vm183_vm12 = vcmp.eq.f32.partialorder %v175_v14, %v179_v22  ;;  %v217_v40 = vsub.f32 %v179_v22, %v395_v54 }
 0x287   :  { %v185_v23 = vsel %vm183_vm12, %v393_v53, 5 }
 0x288   :  { %v187_v24 = vsel %vm132_vm3, %v185_v23, 2147483647  ;;  %v219_v41 = vmul.f32 1.442695, %v217_v40 }
 0x289   :  { %v189_v25 = vshra.s32 %v187_v24, 16  ;;  %v188_v32 = vand.u32 65535, %v187_v24 }
 0x28a   :  { %301 = vpow2.f32 %v219_v41 }
 0x28b   :  { %v191_v26 = vcvt.s32.f32 %v189_v25  ;;  %v190_v34 = vcvt.s32.f32 %v188_v32 }
 0x28d   :  { %v182_v27 = vpop.xlane.xlu1 %181  ;;  %192 = vmin.xlane.f32.xlu2 %v191_v26 }
 0x28e   :  { %vm184_vm13 = vcmp.eq.f32.partialorder %v176_v20, %v182_v27  ;;  %v218_v42 = vsub.f32 %v182_v27, %v400_v59 }
 0x28f   :  { %v186_v28 = vsel %vm184_vm13, %v393_v53, 5 }
 0x290   :  { %v202_v29 = vsel %vm132_vm3, %v186_v28, 2147483647  ;;  %v221_v43 = vmul.f32 1.442695, %v218_v42  ;;  %v302_v44 = vpop.eup %301 }
 0x291   :  { %v204_v30 = vshra.s32 %v202_v29, 16  ;;  %v203_v36 = vand.u32 65535, %v202_v29  ;;  %v223_v45 = vadd.f32 1.0, %v302_v44 }
 0x292   :  { %303 = vpow2.f32 %v221_v43 }
 0x293   :  { %v206_v31 = vcvt.s32.f32 %v204_v30  ;;  %v205_v38 = vcvt.s32.f32 %v203_v36  ;;  %305 = vrcp.f32 %v223_v45  ;;  %v236_v57 = vand.u32 2147483648, %v223_v45 }
 0x294   :  { %vm230_vm1 = vweird.f32 %v223_v45  ;;  %v234_v58 = vand.u32 2147483647, %v223_v45 }
 0x295   :  { %207 = vmin.xlane.f32.xlu0 %v206_v31  ;;  %v237_v62 = vor.u32 1.1754944e-38, %v236_v57 }
 0x296   :  { %vm235_vm4 = vcmp.eq.f32.partialorder %v234_v58, 8.507059e+37 }
 0x298   :  { %v304_v46 = vpop.eup %303 }
 0x299   :  { %v224_v47 = vadd.f32 1.0, %v304_v46  ;;  %v306_v48 = vpop.eup %305 }
 0x29a   :  { %v226_v49 = vmul.f32 %v306_v48, %v223_v45  ;;  %vm231_vm0 = vweird.f32 %v306_v48 }
 0x29b   :  { %307 = vrcp.f32 %v224_v47  ;;  %vm232_vm2 = vmor %vm230_vm1, %vm231_vm0  ;;  %v251_v5 = vand.u32 2147483648, %v224_v47  ;;  %vm245_vm8 = vweird.f32 %v224_v47  ;;  %v249_v7 = vand.u32 2147483647, %v224_v47 }
 0x29c   :  { %v227_v50 = vsub.f32 1.0, %v226_v49 }
 0x29d   :  { %v252_v14 = vor.u32 1.1754944e-38, %v251_v5  ;;  %vm250_vm13 = vcmp.eq.f32.partialorder %v249_v7, 8.507059e+37 }
 0x29e   :  { %v228_v52 = vmul.f32 %v306_v48, %v227_v50 }
 0x2a0   :  { %v229_v56 = vadd.f32 %v306_v48, %v228_v52 }
 0x2a1   :  { %v308_v51 = vpop.eup %307 }
 0x2a2   :  { %v241_v55 = vmul.f32 %v308_v51, %v224_v47  ;;  %v233_v60 = vsel %vm232_vm2, %v306_v48, %v229_v56  ;;  %vm246_vm6 = vweird.f32 %v308_v51 }
 0x2a3   :  { %v238_v1 = vsel %vm235_vm4, %v237_v62, %v233_v60  ;;  %vm247_vm12 = vmor %vm245_vm8, %vm246_vm6 }
 0x2a4   :  { %v242_v54 = vsub.f32 1.0, %v241_v55  ;;  %v257_v6 = vmul.f32 %v302_v44, %v238_v1 }
 0x2a6   :  { %v243_v61 = vmul.f32 %v308_v51, %v242_v54 }
 0x2a8   :  { %v244_v3 = vadd.f32 %v308_v51, %v243_v61 }
 0x2aa   :  { %v248_v11 = vsel %vm247_vm12, %v308_v51, %v244_v3 }
 0x2ab   :  { %v253_v17 = vsel %vm250_vm13, %v252_v14, %v248_v11 }
 0x2ac   :  { %v258_v21 = vmul.f32 %v304_v46, %v253_v17 }
 0x300   :  { %v193_v33 = vpop.xlane.xlu2 %192 }
 0x301   :  { %vm194_vm14 = vcmp.eq.f32.partialorder %v191_v26, %v193_v33  ;;  %v199_v59 = vcvt.f32.s32 %v193_v33 }
 0x302   :  { %v195_v35 = vsel %vm194_vm14, %v190_v34, inf }
 0x303   :  { %196 = vmin.xlane.f32.xlu1 %v195_v35  ;;  %v200_v0 = vshll.u32 %v199_v59, 16 }
 0x308   :  { %v208_v37 = vpop.xlane.xlu0 %207 }
 0x309   :  { %vm209_vm15 = vcmp.eq.f32.partialorder %v206_v31, %v208_v37  ;;  %v214_v8 = vcvt.f32.s32 %v208_v37 }
 0x30a   :  { %v210_v39 = vsel %vm209_vm15, %v205_v38, inf }
 0x30b   :  { %211 = vmin.xlane.f32.xlu2 %v210_v39  ;;  %v215_v16 = vshll.u32 %v214_v8, 16 }
 0x376   :  { %v197_v63 = vpop.xlane.xlu1 %196 }
 0x377   :  { %v198_v2 = vcvt.f32.s32 %v197_v63 }
 0x379   :  { %v201_v4 = vadd.s32 %v200_v0, %v198_v2 }
 0x37b   :  { %vm255_vm9 = vcmp.eq.s32.totalorder %v393_v53, %v201_v4  ;;  %v266_v9 = vsel %vm265_vm5, %v405_v12, %v201_v4 }
 0x37c   :  { %v259_v10 = vsel %vm255_vm9, %v257_v6, 0.0  ;;  %269 = vst.msk [vmem:[%s464_s7] sm:$0xff] %vm268_vm7, %v266_v9 }
 0x37d   :  { %v261_v13 = vsel %vm173_vm10, %v238_v1, %v259_v10 }
 0x37e   :  { %263 = vst.msk [vmem:[%s465_s6] sm:$0xff] %vm132_vm3, %v261_v13  ;;  %v212_v15 = vpop.xlane.xlu2 %211 }
 0x37f   :  { %v213_v18 = vcvt.f32.s32 %v212_v15 }
 0x381   :  { %v216_v20 = vadd.s32 %v215_v16, %v213_v18 }
 0x383   :  { %vm256_vm14 = vcmp.eq.s32.totalorder %v393_v53, %v216_v20  ;;  %v267_v12 = vsel %vm265_vm5, %v413_v19, %v216_v20 }
 0x384   :  { %v260_v22 = vsel %vm256_vm14, %v258_v21, 0.0  ;;  %270 = vst.msk [vmem:[%s464_s7 + $0x8] sm:$0xff] %vm268_vm7, %v267_v12 }
 0x385   :  { %v262_v23 = vsel %vm174_vm11, %v253_v17, %v260_v22 }
 0x386   :  { %264 = vst.msk [vmem:[%s465_s6 + $0x8] sm:$0xff] %vm132_vm3, %v262_v23 }

</bundles_post_ra>
